<compile_context>
chip_gen: v7x
topology: tpu7x:2x2x1
jax: 0.10.0
libtpu: 0.0.40
codegen_flags: <defaults>
</compile_context>

<pallas_src>
import jax
import jax.numpy as jnp
from jax.experimental import pallas as pl
from jax.experimental.pallas import tpu as pltpu

C_IN = 352
C_PAD = 384          # 3 * 128 -> lane-dense last dim
CB = 128             # channels per grid block (lane-aligned)
KH = KW = 3
STRIDE = 2
PAD = 1


def dwconv3x3s2_kernel(x_ref, w_ref, o_ref):
    # x_ref : (2, 2, Hh+1, Wh+1, CB) parity-decomposed, halo-padded input slab
    # w_ref : (9, 1, 1, CB)          flat filter taps, k = kh*3 + kw
    # o_ref : (OH, OW, CB)           output tile (one batch item, one channel block)
    oh, ow, cb = o_ref.shape

    w_all = w_ref[...].astype(jnp.float32)       # load the tap table once

    acc = None
    for kh in range(KH):
        rh = (kh + 1) % STRIDE
        qh = (kh + 1) // STRIDE
        for kw in range(KW):
            rw = (kw + 1) % STRIDE
            qw = (kw + 1) // STRIDE
            # x_zeropad[2h+kh-1, 2w+kw-1, c] == x_ref[rh, rw, h+qh, w+qw, c]
            patch = x_ref[rh, rw, qh:qh + oh, qw:qw + ow, :].astype(jnp.float32)
            term = patch * w_all[kh * KW + kw]
            acc = term if acc is None else acc + term
    o_ref[...] = acc.astype(o_ref.dtype)


def depthwise_conv3x3_s2(x_nchw, w_oihw):
    n, c, h, w = x_nchw.shape
    assert c == C_IN and w_oihw.shape == (C_IN, 1, KH, KW)
    assert h % STRIDE == 0 and w % STRIDE == 0
    hh, wh = h // STRIDE, w // STRIDE
    oh = (h + 2 * PAD - KH) // STRIDE + 1      # == hh for even h
    ow = (w + 2 * PAD - KW) // STRIDE + 1      # == wh
    cp = C_PAD
    n_cb = cp // CB

    # --- single fused layout pass: NCHW -> parity-decomposed, halo- & channel-padded ---
    # xr[b, c, i, rh, j, rw] = x[b, c, 2i+rh, 2j+rw]                       (free reshape)
    xr = x_nchw.reshape(n, c, hh, STRIDE, wh, STRIDE)
    # channel pad to 384 + 1-element leading zero halo on i and j (covers the conv's
    # top/left padding; bottom/right padding is never read for even H, W)
    xr = jnp.pad(xr, ((0, 0), (0, cp - c), (1, 0), (0, 0), (1, 0), (0, 0)))
    # (n, rh, rw, i, j, c): one copy pass; channels land on the lane dim
    x_in = jnp.transpose(xr, (0, 3, 5, 2, 4, 1))

    # filter: (C, 1, 3, 3) -> (9, 1, 1, Cp), k = kh*3 + kw
    w9 = jnp.transpose(w_oihw[:, 0, :, :].reshape(c, KH * KW), (1, 0))
    w9 = jnp.pad(w9, ((0, 0), (0, cp - c))).reshape(KH * KW, 1, 1, cp)

    out = pl.pallas_call(
        dwconv3x3s2_kernel,
        out_shape=jax.ShapeDtypeStruct((n, oh, ow, cp), x_nchw.dtype),
        grid=(n, n_cb),
        in_specs=[
            pl.BlockSpec((None, STRIDE, STRIDE, hh + 1, wh + 1, CB),
                         lambda b, cb: (b, 0, 0, 0, 0, cb)),
            pl.BlockSpec((KH * KW, 1, 1, CB), lambda b, cb: (0, 0, 0, cb)),
        ],
        out_specs=pl.BlockSpec((None, oh, ow, CB), lambda b, cb: (b, 0, 0, cb)),
        compiler_params=pltpu.CompilerParams(
            dimension_semantics=("parallel", "parallel")),
    )(x_in, w9)

    # drop channel padding, back to NCHW (module boundary is NCHW).
    # TODO(synk): if the surrounding graph can consume channels-last, skip this transpose
    # and return out[..., :c] directly — the op is overhead-bound at 14x14.
    return jnp.transpose(out[..., :c], (0, 3, 1, 2))


if __name__ == "__main__":
    key = jax.random.PRNGKey(0)
    kx, kw = jax.random.split(key)
    # Shapes implied by the module: x280 = [1, 352, 14, 14], weight = [352, 1, 3, 3]
    x = jax.random.normal(kx, (1, C_IN, 14, 14), dtype=jnp.float32)
    wgt = jax.random.normal(kw, (C_IN, 1, KH, KW), dtype=jnp.float32) * 0.1

    out = depthwise_conv3x3_s2(x, wgt)
    out = jax.block_until_ready(out)
    assert out.shape == (1, C_IN, 7, 7), out.shape

    # Reference check against XLA's grouped conv (same semantics as nn.Conv2d).
    ref = jax.lax.conv_general_dilated(
        x, wgt, window_strides=(STRIDE, STRIDE),
        padding=((PAD, PAD), (PAD, PAD)),
        feature_group_count=C_IN,
        dimension_numbers=("NCHW", "OIHW", "NCHW"))
    assert jnp.allclose(out, ref, atol=1e-4, rtol=1e-4), \
        float(jnp.max(jnp.abs(out - ref)))

    print("KERNEL_OK")
</pallas_src>

<mosaic_0001>
module attributes {stable_mosaic.version = 11 : i64} {
  func.func @dwconv3x3s2_kernel(%arg0: i32, %arg1: i32, %arg2: memref<1x2x2x8x8x128xf32, #tpu.memory_space<vmem>>, %arg3: memref<9x1x1x128xf32, #tpu.memory_space<vmem>>, %arg4: memref<1x7x7x128xf32, #tpu.memory_space<vmem>>) attributes {dimension_semantics = [#tpu.dimension_semantics<parallel>, #tpu.dimension_semantics<parallel>], iteration_bounds = array<i64: 1, 3>, scalar_prefetch = 0 : i64, scratch_operands = 0 : i64, tpu.core_type = #tpu.core_type<tc>, window_params = [{transform_indices = @transform_0, window_bounds = array<i64: 1, 2, 2, 8, 8, 128>}, {transform_indices = @transform_1, window_bounds = array<i64: 9, 1, 1, 128>}, {transform_indices = @transform_2, window_bounds = array<i64: 1, 7, 7, 128>}]} {
    %c0 = arith.constant 0 : index
    %c0_0 = arith.constant 0 : index
    %c0_1 = arith.constant 0 : index
    %c0_2 = arith.constant 0 : index
    %0 = vector.load %arg3[%c0, %c0_0, %c0_1, %c0_2] : memref<9x1x1x128xf32, #tpu.memory_space<vmem>>, vector<9x1x1x128xf32>
    %c0_3 = arith.constant 0 : index
    %c1 = arith.constant 1 : index
    %c1_4 = arith.constant 1 : index
    %c0_5 = arith.constant 0 : index
    %c0_6 = arith.constant 0 : index
    %c0_7 = arith.constant 0 : index
    %1 = vector.load %arg2[%c0_3, %c1, %c1_4, %c0_5, %c0_6, %c0_7] : memref<1x2x2x8x8x128xf32, #tpu.memory_space<vmem>>, vector<1x1x1x7x7x128xf32>
    %2 = vector.shape_cast %1 : vector<1x1x1x7x7x128xf32> to vector<7x7x128xf32>
    %3 = vector.extract_strided_slice %0 {offsets = [0, 0, 0, 0], sizes = [1, 1, 1, 128], strides = [1, 1, 1, 1]} : vector<9x1x1x128xf32> to vector<1x1x1x128xf32>
    %4 = vector.shape_cast %3 : vector<1x1x1x128xf32> to vector<1x1x128xf32>
    %5 = vector.broadcast %4 : vector<1x1x128xf32> to vector<7x7x128xf32>
    %6 = arith.mulf %2, %5 : vector<7x7x128xf32>
    %c0_8 = arith.constant 0 : index
    %c1_9 = arith.constant 1 : index
    %c0_10 = arith.constant 0 : index
    %c0_11 = arith.constant 0 : index
    %c1_12 = arith.constant 1 : index
    %c0_13 = arith.constant 0 : index
    %7 = vector.load %arg2[%c0_8, %c1_9, %c0_10, %c0_11, %c1_12, %c0_13] : memref<1x2x2x8x8x128xf32, #tpu.memory_space<vmem>>, vector<1x1x1x7x7x128xf32>
    %8 = vector.shape_cast %7 : vector<1x1x1x7x7x128xf32> to vector<7x7x128xf32>
    %9 = vector.extract_strided_slice %0 {offsets = [1, 0, 0, 0], sizes = [1, 1, 1, 128], strides = [1, 1, 1, 1]} : vector<9x1x1x128xf32> to vector<1x1x1x128xf32>
    %10 = vector.shape_cast %9 : vector<1x1x1x128xf32> to vector<1x1x128xf32>
    %11 = vector.broadcast %10 : vector<1x1x128xf32> to vector<7x7x128xf32>
    %12 = arith.mulf %8, %11 : vector<7x7x128xf32>
    %13 = arith.addf %6, %12 : vector<7x7x128xf32>
    %c0_14 = arith.constant 0 : index
    %c1_15 = arith.constant 1 : index
    %c1_16 = arith.constant 1 : index
    %c0_17 = arith.constant 0 : index
    %c1_18 = arith.constant 1 : index
    %c0_19 = arith.constant 0 : index
    %14 = vector.load %arg2[%c0_14, %c1_15, %c1_16, %c0_17, %c1_18, %c0_19] : memref<1x2x2x8x8x128xf32, #tpu.memory_space<vmem>>, vector<1x1x1x7x7x128xf32>
    %15 = vector.shape_cast %14 : vector<1x1x1x7x7x128xf32> to vector<7x7x128xf32>
    %16 = vector.extract_strided_slice %0 {offsets = [2, 0, 0, 0], sizes = [1, 1, 1, 128], strides = [1, 1, 1, 1]} : vector<9x1x1x128xf32> to vector<1x1x1x128xf32>
    %17 = vector.shape_cast %16 : vector<1x1x1x128xf32> to vector<1x1x128xf32>
    %18 = vector.broadcast %17 : vector<1x1x128xf32> to vector<7x7x128xf32>
    %19 = arith.mulf %15, %18 : vector<7x7x128xf32>
    %20 = arith.addf %13, %19 : vector<7x7x128xf32>
    %c0_20 = arith.constant 0 : index
    %c0_21 = arith.constant 0 : index
    %c1_22 = arith.constant 1 : index
    %c1_23 = arith.constant 1 : index
    %c0_24 = arith.constant 0 : index
    %c0_25 = arith.constant 0 : index
    %21 = vector.load %arg2[%c0_20, %c0_21, %c1_22, %c1_23, %c0_24, %c0_25] : memref<1x2x2x8x8x128xf32, #tpu.memory_space<vmem>>, vector<1x1x1x7x7x128xf32>
    %22 = vector.shape_cast %21 : vector<1x1x1x7x7x128xf32> to vector<7x7x128xf32>
    %23 = vector.extract_strided_slice %0 {offsets = [3, 0, 0, 0], sizes = [1, 1, 1, 128], strides = [1, 1, 1, 1]} : vector<9x1x1x128xf32> to vector<1x1x1x128xf32>
    %24 = vector.shape_cast %23 : vector<1x1x1x128xf32> to vector<1x1x128xf32>
    %25 = vector.broadcast %24 : vector<1x1x128xf32> to vector<7x7x128xf32>
    %26 = arith.mulf %22, %25 : vector<7x7x128xf32>
    %27 = arith.addf %20, %26 : vector<7x7x128xf32>
    %c0_26 = arith.constant 0 : index
    %c0_27 = arith.constant 0 : index
    %c0_28 = arith.constant 0 : index
    %c1_29 = arith.constant 1 : index
    %c1_30 = arith.constant 1 : index
    %c0_31 = arith.constant 0 : index
    %28 = vector.load %arg2[%c0_26, %c0_27, %c0_28, %c1_29, %c1_30, %c0_31] : memref<1x2x2x8x8x128xf32, #tpu.memory_space<vmem>>, vector<1x1x1x7x7x128xf32>
    %29 = vector.shape_cast %28 : vector<1x1x1x7x7x128xf32> to vector<7x7x128xf32>
    %30 = vector.extract_strided_slice %0 {offsets = [4, 0, 0, 0], sizes = [1, 1, 1, 128], strides = [1, 1, 1, 1]} : vector<9x1x1x128xf32> to vector<1x1x1x128xf32>
    %31 = vector.shape_cast %30 : vector<1x1x1x128xf32> to vector<1x1x128xf32>
    %32 = vector.broadcast %31 : vector<1x1x128xf32> to vector<7x7x128xf32>
    %33 = arith.mulf %29, %32 : vector<7x7x128xf32>
    %34 = arith.addf %27, %33 : vector<7x7x128xf32>
    %c0_32 = arith.constant 0 : index
    %c0_33 = arith.constant 0 : index
    %c1_34 = arith.constant 1 : index
    %c1_35 = arith.constant 1 : index
    %c1_36 = arith.constant 1 : index
    %c0_37 = arith.constant 0 : index
    %35 = vector.load %arg2[%c0_32, %c0_33, %c1_34, %c1_35, %c1_36, %c0_37] : memref<1x2x2x8x8x128xf32, #tpu.memory_space<vmem>>, vector<1x1x1x7x7x128xf32>
    %36 = vector.shape_cast %35 : vector<1x1x1x7x7x128xf32> to vector<7x7x128xf32>
    %37 = vector.extract_strided_slice %0 {offsets = [5, 0, 0, 0], sizes = [1, 1, 1, 128], strides = [1, 1, 1, 1]} : vector<9x1x1x128xf32> to vector<1x1x1x128xf32>
    %38 = vector.shape_cast %37 : vector<1x1x1x128xf32> to vector<1x1x128xf32>
    %39 = vector.broadcast %38 : vector<1x1x128xf32> to vector<7x7x128xf32>
    %40 = arith.mulf %36, %39 : vector<7x7x128xf32>
    %41 = arith.addf %34, %40 : vector<7x7x128xf32>
    %c0_38 = arith.constant 0 : index
    %c1_39 = arith.constant 1 : index
    %c1_40 = arith.constant 1 : index
    %c1_41 = arith.constant 1 : index
    %c0_42 = arith.constant 0 : index
    %c0_43 = arith.constant 0 : index
    %42 = vector.load %arg2[%c0_38, %c1_39, %c1_40, %c1_41, %c0_42, %c0_43] : memref<1x2x2x8x8x128xf32, #tpu.memory_space<vmem>>, vector<1x1x1x7x7x128xf32>
    %43 = vector.shape_cast %42 : vector<1x1x1x7x7x128xf32> to vector<7x7x128xf32>
    %44 = vector.extract_strided_slice %0 {offsets = [6, 0, 0, 0], sizes = [1, 1, 1, 128], strides = [1, 1, 1, 1]} : vector<9x1x1x128xf32> to vector<1x1x1x128xf32>
    %45 = vector.shape_cast %44 : vector<1x1x1x128xf32> to vector<1x1x128xf32>
    %46 = vector.broadcast %45 : vector<1x1x128xf32> to vector<7x7x128xf32>
    %47 = arith.mulf %43, %46 : vector<7x7x128xf32>
    %48 = arith.addf %41, %47 : vector<7x7x128xf32>
    %c0_44 = arith.constant 0 : index
    %c1_45 = arith.constant 1 : index
    %c0_46 = arith.constant 0 : index
    %c1_47 = arith.constant 1 : index
    %c1_48 = arith.constant 1 : index
    %c0_49 = arith.constant 0 : index
    %49 = vector.load %arg2[%c0_44, %c1_45, %c0_46, %c1_47, %c1_48, %c0_49] : memref<1x2x2x8x8x128xf32, #tpu.memory_space<vmem>>, vector<1x1x1x7x7x128xf32>
    %50 = vector.shape_cast %49 : vector<1x1x1x7x7x128xf32> to vector<7x7x128xf32>
    %51 = vector.extract_strided_slice %0 {offsets = [7, 0, 0, 0], sizes = [1, 1, 1, 128], strides = [1, 1, 1, 1]} : vector<9x1x1x128xf32> to vector<1x1x1x128xf32>
    %52 = vector.shape_cast %51 : vector<1x1x1x128xf32> to vector<1x1x128xf32>
    %53 = vector.broadcast %52 : vector<1x1x128xf32> to vector<7x7x128xf32>
    %54 = arith.mulf %50, %53 : vector<7x7x128xf32>
    %55 = arith.addf %48, %54 : vector<7x7x128xf32>
    %c0_50 = arith.constant 0 : index
    %c1_51 = arith.constant 1 : index
    %c1_52 = arith.constant 1 : index
    %c1_53 = arith.constant 1 : index
    %c1_54 = arith.constant 1 : index
    %c0_55 = arith.constant 0 : index
    %56 = vector.load %arg2[%c0_50, %c1_51, %c1_52, %c1_53, %c1_54, %c0_55] : memref<1x2x2x8x8x128xf32, #tpu.memory_space<vmem>>, vector<1x1x1x7x7x128xf32>
    %57 = vector.shape_cast %56 : vector<1x1x1x7x7x128xf32> to vector<7x7x128xf32>
    %58 = vector.extract_strided_slice %0 {offsets = [8, 0, 0, 0], sizes = [1, 1, 1, 128], strides = [1, 1, 1, 1]} : vector<9x1x1x128xf32> to vector<1x1x1x128xf32>
    %59 = vector.shape_cast %58 : vector<1x1x1x128xf32> to vector<1x1x128xf32>
    %60 = vector.broadcast %59 : vector<1x1x128xf32> to vector<7x7x128xf32>
    %61 = arith.mulf %57, %60 : vector<7x7x128xf32>
    %62 = arith.addf %55, %61 : vector<7x7x128xf32>
    %c0_56 = arith.constant 0 : index
    %c0_57 = arith.constant 0 : index
    %c0_58 = arith.constant 0 : index
    %c0_59 = arith.constant 0 : index
    %63 = vector.load %arg4[%c0_56, %c0_57, %c0_58, %c0_59] : memref<1x7x7x128xf32, #tpu.memory_space<vmem>>, vector<1x7x7x128xf32>
    %64 = vector.shape_cast %63 : vector<1x7x7x128xf32> to vector<7x7x128xf32>
    %65 = vector.shape_cast %62 : vector<7x7x128xf32> to vector<1x7x7x128xf32>
    tpu.vector_store %arg4[%c0_56, %c0_57, %c0_58, %c0_59], %65 {strides = array<i32>} : memref<1x7x7x128xf32, #tpu.memory_space<vmem>>, vector<1x7x7x128xf32>,
    return
  }
  func.func @transform_0(%arg0: i32, %arg1: i32) -> (i32, i32, i32, i32, i32, i32) {
    %c0_i32 = arith.constant 0 : i32
    %c0_i32_0 = arith.constant 0 : i32
    %c0_i32_1 = arith.constant 0 : i32
    %c0_i32_2 = arith.constant 0 : i32
    %c0_i32_3 = arith.constant 0 : i32
    return %arg0, %c0_i32, %c0_i32_0, %c0_i32_1, %c0_i32_2, %arg1 : i32, i32, i32, i32, i32, i32
  }
  func.func @transform_1(%arg0: i32, %arg1: i32) -> (i32, i32, i32, i32) {
    %c0_i32 = arith.constant 0 : i32
    %c0_i32_0 = arith.constant 0 : i32
    %c0_i32_1 = arith.constant 0 : i32
    %c0_i32_2 = arith.constant 0 : i32
    return %c0_i32, %c0_i32_0, %c0_i32_1, %arg1 : i32, i32, i32, i32
  }
  func.func @transform_2(%arg0: i32, %arg1: i32) -> (i32, i32, i32, i32) {
    %c0_i32 = arith.constant 0 : i32
    %c0_i32_0 = arith.constant 0 : i32
    %c0_i32_1 = arith.constant 0 : i32
    return %arg0, %c0_i32, %c0_i32_0, %arg1 : i32, i32, i32, i32
  }
}

</mosaic_0001>

<bundles_post_ra>
// kernel: tpu_custom_call.1
= control target key start
LH: loop header
LB: loop body
LE: loop exit
PB: predicated region body
PF: predicated region fallthrough
CT: control target
= control target key end

     0   :  { %7 = vsyncpa [#allocation3], 0  ;;  %s1281_s0 = inlined_call_operand.hbm [shape: f32[1,2,2,8,8,384], index: 0, kind: input, shape index: {}]   ;;  %s1282_s1 = inlined_call_operand.hbm [shape: f32[9,1,1,384], index: 1, kind: input, shape index: {}]   ;;  %s1283_s2 = inlined_call_operand.vmem [shape: f32[1,7,7,384], index: 2, kind: output, shape index: {}]  }
   0x1   :  { %9 = vsyncpa [#allocation3 + $0x1], 0 }
   0x2   :  { %10 = vsyncpa [#allocation5], 0 }
   0x3   :  { %12 = vsyncpa [#allocation5 + $0x1], 0  ;;  %s928_s9 = smov 0   ;;  %s930_s10 = smov 0  }
   0x4   :  { %s932_s11 = smov 0   ;;  %s934_s12 = smov 0  }
   0x5   :  { %s936_s13 = smov 0   ;;  %s938_s14 = smov 0  }
   0x6 LB: > { %s636_s15 = sadd.s32 4294967295, %s903_s14   ;;  %s27_s16 = sadd.s32 1, %s899_s13  ;;  %s903_s14 = sphi %s938_s14, %s18_s14   ;;  %s899_s13 = sphi %s936_s13, %s1297_s13   ;;  %s895_s12 = sphi %s934_s12, %s1296_s12   ;;  %s891_s11 = sphi %s932_s11, %s1295_s11   ;;  %s887_s10 = sphi %s930_s10, %s1294_s10   ;;  %s883_s9 = sphi %s928_s9, %s1293_s9  }
   0x7   : > { %p28_p0 = scmp.ge.s32.totalorder %s27_s16, 3  ;;  %s39_s17 = sadd.s32 1, %s891_s11 }
   0x8   : > { %p46_p1 = scmp.ne.s32.totalorder %s891_s11, %s887_s10  ;;  %p47_p2 = scmp.eq.s32.totalorder %s903_s14, 0 }
   0x9   : > { %s1299_s16 = smov (%p28_p0, %s27_s16), 0  ;;  %p52_p4 = scmp.ne.s32.totalorder %s887_s10, %s883_s9 }
   0xa   : > { %p964_p3 = por %p47_p2, %p46_p1  ;;  %s35_s19 = ssub.s32 %s899_s13, %s1299_s16 }
   0xb   : > { %p53_p5 = scmp.eq.s32.totalorder %s636_s15, 0  ;;  %p37_p6 = scmp.eq.s32.totalorder %s35_s19, 0 }
   0xc   : > { %p104_p7 = scmp.eq.s32.totalorder %s636_s15, 2  ;;  %p734_p10 = scmp.lt.s32.totalorder %s903_s14, 3 }
   0xd   : > { %p971_p8 = por %p53_p5, %p52_p4  ;;  %s984_s23 = sand.u32 1, %s891_s11  }
   0xe   : > { %s976_s21 = scalar_select %p37_p6, %s891_s11, %s39_s17  }
   0xf   : > { %s1286_s20 = scalar_select %p971_p8, 1, 0 }
  0x10   : > { %p978_p9 = por %p104_p7, %p46_p1  ;;  %s641_s24 = sshll.u32 %s899_s13, 7 }
  0x11   : > { %s640_s25 = sshll.u32 %s984_s23, 8  ;;  %s991_s28 = scalar_lea.hbm %s1281_s0, %s641_s24 }
  0x12   : > { %s1287_s22 = scalar_select %p978_p9, 1, 0 }
  0x13   : > { %s134_s29 = scalar_lea.vmem [#allocation2], %s640_s25  ;;  %p995_p11 = pnand %p734_p10, %p964_p3 }
  0x14   : > { %s142_s30 = sshll.u32 %s134_s29, 4  ;;  %s131_s4 = scalar_lea.sflag [#allocation3], %s984_s23  ;;  %s999_s30 = int_to_ptr.vmem [resolvable:$true] %s142_s30 }
  0x15   : > { %s789_s5 = scalar_lea.hbm %s991_s28, 4096  ;;  %p791_p0 = pneg %p995_p11 }
  0x16   : > { %p790_p13 = scmp.ne.s32.totalorder %s991_s28, %s789_s5  ;;  %s794_s8 = scalar_lea.hbm %s1281_s0, 12288 }
  0x17   : > { %p795_p3 = scmp.lt.u32.totalorder %s991_s28, %s1281_s0  ;;  %p796_p4 = scmp.lt.u32.totalorder %s794_s8, %s789_s5 }
  0x18   : > { %p792_p1 = pnand %p791_p0, %p790_p13  ;;  %p798_p6 = scmp.lt.u32.totalorder %s789_s5, %s991_s28 }
  0x19   : > { %p797_p5 = por %p796_p4, %p795_p3 }
  0x1a   : > { %p793_p2 = pneg %p792_p1 }
  0x1b   : > { %p799_p7 = por %p798_p6, %p797_p5 }
  0x1d   : > { %p800_p10 = pnand %p799_p7, %p793_p2 }
  0x1f   : > { %803 = shalt.err (!%p800_p10)
}
  0x20   : > { %s804_s17 = scalar_lea.vmem %s999_s30, 4096  ;;  %s905_s18 = smov [#allocation2]  }
  0x21   : > { %p805_p13 = scmp.ne.s32.totalorder %s999_s30, %s804_s17  ;;  %s809_s19 = sshll.u32 %s905_s18, 4  ;;  %s810_s19 = int_to_ptr.vmem [resolvable:$false] %s809_s19 }
  0x22   : > { %s811_s24 = scalar_lea.vmem %s810_s19, 8192  ;;  %p812_p9 = scmp.lt.s32.totalorder %s999_s30, %s810_s19 }
  0x23   : > { %p807_p1 = pnand %p805_p13, %p791_p0  ;;  %p813_p3 = scmp.lt.s32.totalorder %s811_s24, %s804_s17 }
  0x25   : > { %p808_p12 = pneg %p807_p1  ;;  %p814_p4 = por %p813_p3, %p812_p9 }
  0x27   : > { %p815_p5 = pnand %p814_p4, %p808_p12 }
  0x29   : > { %818 = shalt.err (!%p815_p5)
}
  0x2a   : > { %s906_s25 = smov 384   ;;  %s907_s26 = smov 128  }
  0x2b   : > { %s908_s27 = smov 8   ;;  %p170_p2 = scmp.lt.s32.totalorder %s903_s14, 4 }
  0x2c   : > { %730 = dma.hbm_to_vmem [thread:$0]  (!%p995_p11), %s991_s28, 4096, %s999_s30, %s131_s4, %s906_s25, %s907_s26, %s908_s27  }
  0x2d   : > { %s720_s29 = smul.u32 9, %s984_s23  ;;  %s642_s5 = sshll.u32 %s899_s13, 4 }
  0x2e   : > { %p1289_p9 = scmp.ge.s32.totalorder %s903_s14, 1  ;;  %s1042_s9 = scalar_lea.hbm %s1282_s1, %s642_s5 }
  0x2f   : > { %s156_s15 = scalar_lea.vmem [#allocation4], %s720_s29  ;;  %s153_s28 = scalar_lea.sflag [#allocation5], %s984_s23 }
  0x30   : > { %p1035_p12 = pnand %p1289_p9, %p170_p2  ;;  %s162_s17 = sshll.u32 %s156_s15, 4  ;;  %s1044_s17 = int_to_ptr.vmem [resolvable:$true] %s162_s17 }
  0x31   : > { %s819_s30 = scalar_lea.hbm %s1042_s9, 144  ;;  %s824_s19 = scalar_lea.hbm %s1282_s1, 432 }
  0x32   : > { %p820_p6 = scmp.ne.s32.totalorder %s1042_s9, %s819_s30  ;;  %p825_p13 = scmp.lt.u32.totalorder %s1042_s9, %s1282_s1 }
  0x33   : > { %p826_p1 = scmp.lt.u32.totalorder %s824_s19, %s819_s30  ;;  %p828_p4 = scmp.lt.u32.totalorder %s819_s30, %s1042_s9 }
  0x34   : > { %p822_p7 = pnand %p820_p6, %p791_p0 }
  0x35   : > { %p827_p3 = por %p826_p1, %p825_p13 }
  0x36   : > { %p823_p10 = pneg %p822_p7 }
  0x37   : > { %p829_p5 = por %p828_p4, %p827_p3 }
  0x39   : > { %p830_p2 = pnand %p829_p5, %p823_p10 }
  0x3b   : > { %833 = shalt.err (!%p830_p2)
}
  0x3c   : > { %s834_s26 = scalar_lea.vmem %s1044_s17, 144  ;;  %s909_s27 = smov [#allocation4]  }
  0x3d   : > { %p835_p9 = scmp.ne.s32.totalorder %s1044_s17, %s834_s26  ;;  %s839_s29 = sshll.u32 %s909_s27, 4  ;;  %s840_s29 = int_to_ptr.vmem [resolvable:$false] %s839_s29 }
  0x3e   : > { %s841_s5 = scalar_lea.vmem %s840_s29, 288  ;;  %p842_p8 = scmp.lt.s32.totalorder %s1044_s17, %s840_s29 }
  0x3f   : > { %p837_p6 = pnand %p835_p9, %p791_p0  ;;  %p843_p13 = scmp.lt.s32.totalorder %s841_s5, %s834_s26 }
  0x41   : > { %p838_p7 = pneg %p837_p6  ;;  %p844_p1 = por %p843_p13, %p842_p8 }
  0x43   : > { %p845_p3 = pnand %p844_p1, %p838_p7 }
  0x45   : > { %848 = shalt.err (!%p845_p3)
}
  0x46   : > { %s910_s7 = smov 48   ;;  %s911_s8 = smov 16  }
  0x47   : > { %s912_s15 = smov 1   ;;  %174 = sbr.rel (%p1035_p12) target bundleno = 136 (0x88), region = 28 }
  0x48   : > { %733 = dma.hbm_to_vmem [thread:$0]  (!%p995_p11), %s1042_s9, 144, %s1044_s17, %s153_s28, %s910_s7, %s911_s8, %s912_s15  }
  0x49   : > { %s1075_s30 = sand.u32 (!%p1035_p12), 1, %s887_s10   ;;  %p1291_p8 = scmp.ne.s32.totalorder (!%p1035_p12), %s1286_s20, 0 }
  0x4a   : > { %s644_s4 = sshll.u32 (!%p1035_p12), %s1075_s30, 8  ;;  %s177_s18 = scalar_lea.sflag (!%p1035_p12), [#allocation3], %s1075_s30 }
  0x4b   : > { %s1079_s19 = scalar_lea.vmem (!%p1035_p12), [#allocation2], %s644_s4 }
  0x4e   : > { %874 = dma.done.wait (%p1291_p8), %s177_s18, 4096  }
  0x4f   : > { %876 = vsyncadd (%p1291_p8), %s177_s18, 4294963200  ;;  %s721_s23 = smul.u32 9, %s1075_s30  ;;  %s186_s3 = scalar_lea.sflag [#allocation5], %s1075_s30 }
  0x51   : > { %s189_s6 = scalar_lea.vmem [#allocation4], %s721_s23 }
  0x52   : > { %878 = dma.done.wait (%p1291_p8), %s186_s3, 144  }
  0x53   : > { %880 = vsyncadd (%p1291_p8), %s186_s3, 4294967152  ;;  %v1091_v0 = vld [vmem:[%s189_s6] ss:$0 sm:$0xff]  ;;  %v1093_v1 = vld [vmem:[%s189_s6 + $0x1] ss:$0 sm:$0xff]  ;;  %s722_s20 = smul.u32 56, %s1075_s30 }
  0x54   : > { %v1095_v2 = vld [vmem:[%s189_s6 + $0x2] ss:$0 sm:$0xff]  ;;  %v1097_v3 = vld [vmem:[%s189_s6 + $0x3] ss:$0 sm:$0xff]  ;;  %v1099_v4 = vld [vmem:[%s189_s6 + $0x4] ss:$0 sm:$0xff] }
  0x55   : > { %v1101_v5 = vld [vmem:[%s189_s6 + $0x5] ss:$0 sm:$0xff]  ;;  %v1103_v6 = vld [vmem:[%s189_s6 + $0x6] ss:$0 sm:$0xff]  ;;  %v1108_v10 = vld [vmem:[%s189_s6 + $0x7] ss:$0 sm:$0xff] }
  0x56   : > { %v645_v7 = vld [vmem:[%s1079_s19 + $0xc0] sm:$0x7f]  ;;  %v1110_v11 = vld [vmem:[%s189_s6 + $0x8] ss:$0 sm:$0xff]  ;;  %v677_v16 = vld [vmem:[%s1079_s19 + $0x9] sm:$0x7f] }
  0x57   : > { %v653_v8 = vld [vmem:[%s1079_s19 + $0x81] sm:$0x7f]  ;;  %v237_v12 = vmul.f32 %v1091_v0, %v645_v7  ;;  %v669_v15 = vld [vmem:[%s1079_s19 + $0x48] sm:$0x7f]  ;;  %v670_v29 = vld [vmem:[%s1079_s19 + $0x50] sm:$0x7f]  ;;  %v341_v32 = vmul.f32 %v1099_v4, %v677_v16 }
  0x58   : > { %v661_v9 = vld [vmem:[%s1079_s19 + $0xc1] sm:$0x7f]  ;;  %v258_v13 = vmul.f32 %v1093_v1, %v653_v8  ;;  %v685_v17 = vld [vmem:[%s1079_s19 + $0x49] sm:$0x7f]  ;;  %v313_v22 = vmul.f32 %v1097_v3, %v669_v15  ;;  %v678_v30 = vld [vmem:[%s1079_s19 + $0x11] sm:$0x7f]  ;;  %v314_v41 = vmul.f32 %v1097_v3, %v670_v29 }
  0x59   : > { %v285_v14 = vmul.f32 %v1095_v2, %v661_v9  ;;  %v693_v18 = vld [vmem:[%s1079_s19 + $0xc8] sm:$0x7f]  ;;  %v368_v33 = vmul.f32 %v1101_v5, %v685_v17  ;;  %v686_v35 = vld [vmem:[%s1079_s19 + $0x51] sm:$0x7f]  ;;  %v671_v50 = vld [vmem:[%s1079_s19 + $0x58] sm:$0x7f]  ;;  %v342_v52 = vmul.f32 %v1099_v4, %v678_v30 }
  0x5a   : > { %v701_v19 = vld [vmem:[%s1079_s19 + $0x89] sm:$0x7f]  ;;  %v265_v21 = vadd.f32 %v258_v13, %v237_v12  ;;  %v396_v34 = vmul.f32 %v1103_v6, %v693_v18  ;;  %v694_v36 = vld [vmem:[%s1079_s19 + $0xd0] sm:$0x7f]  ;;  %v369_v53 = vmul.f32 %v1101_v5, %v686_v35  ;;  %v679_v55 = vld [vmem:[%s1079_s19 + $0x19] sm:$0x7f]  ;;  %v315_v60 = vmul.f32 %v1097_v3, %v671_v50 }
  0x5b   : > { %v709_v20 = vld [vmem:[%s1079_s19 + $0xc9] sm:$0x7f]  ;;  %v702_v37 = vld [vmem:[%s1079_s19 + $0x91] sm:$0x7f]  ;;  %v424_v38 = vmul.f32 %v1108_v10, %v701_v19  ;;  %v397_v54 = vmul.f32 %v1103_v6, %v694_v36  ;;  %v687_v56 = vld [vmem:[%s1079_s19 + $0x59] sm:$0x7f]  ;;  %v343_v18 = vmul.f32 %v1099_v4, %v679_v55 }
  0x5c   : > { %v646_v23 = vld [vmem:[%s1079_s19 + $0xc8] sm:$0x7f]  ;;  %v292_v31 = vadd.f32 %v285_v14, %v265_v21  ;;  %v1138_v39 = vmul.f32 %v1110_v11, %v709_v20  ;;  %v647_v42 = vld [vmem:[%s1079_s19 + $0xd0] sm:$0x7f]  ;;  %v425_v58 = vmul.f32 %v1108_v10, %v702_v37  ;;  %v648_v61 = vld [vmem:[%s1079_s19 + $0xd8] sm:$0x7f] }
  0x5d   : > { %v654_v24 = vld [vmem:[%s1079_s19 + $0x89] sm:$0x7f]  ;;  %v238_v26 = vmul.f32 %v1091_v0, %v646_v23  ;;  %v655_v43 = vld [vmem:[%s1079_s19 + $0x91] sm:$0x7f]  ;;  %v239_v47 = vmul.f32 %v1091_v0, %v647_v42  ;;  %v656_v62 = vld [vmem:[%s1079_s19 + $0x99] sm:$0x7f]  ;;  %v240_v13 = vmul.f32 %v1091_v0, %v648_v61 }
  0x5e   : > { %v662_v25 = vld [vmem:[%s1079_s19 + $0xc9] sm:$0x7f]  ;;  %v259_v27 = vmul.f32 %v1093_v1, %v654_v24  ;;  %v663_v44 = vld [vmem:[%s1079_s19 + $0xd1] sm:$0x7f]  ;;  %v320_v45 = vadd.f32 %v313_v22, %v292_v31  ;;  %v260_v48 = vmul.f32 %v1093_v1, %v655_v43  ;;  %v664_v63 = vld [vmem:[%s1079_s19 + $0xd9] sm:$0x7f]  ;;  %v261_v14 = vmul.f32 %v1093_v1, %v656_v62 }
  0x5f   : > { %v286_v28 = vmul.f32 %v1095_v2, %v662_v25  ;;  %v710_v46 = vld [vmem:[%s1079_s19 + $0xd1] sm:$0x7f]  ;;  %v287_v49 = vmul.f32 %v1095_v2, %v663_v44  ;;  %v695_v9 = vld [vmem:[%s1079_s19 + $0xd8] sm:$0x7f]  ;;  %v672_v15 = vld [vmem:[%s1079_s19 + $0x60] sm:$0x7f]  ;;  %v288_v19 = vmul.f32 %v1095_v2, %v664_v63  ;;  %v370_v22 = vmul.f32 %v1101_v5, %v687_v56 }
  0x60   : > { %v266_v40 = vadd.f32 %v259_v27, %v238_v26  ;;  %v348_v57 = vadd.f32 %v341_v32, %v320_v45  ;;  %v267_v59 = vadd.f32 %v260_v48, %v239_v47  ;;  %v452_v8 = vmul.f32 %v1110_v11, %v710_v46  ;;  %v703_v12 = vld [vmem:[%s1079_s19 + $0x99] sm:$0x7f]  ;;  %v680_v20 = vld [vmem:[%s1079_s19 + $0x21] sm:$0x7f]  ;;  %v689_v63 = vld [vmem:[%s1079_s19 + $0x69] sm:$0x7f] }
  0x61   : > { %v268_v23 = vadd.f32 %v261_v14, %v240_v13  ;;  %v316_v24 = vmul.f32 %v1097_v3, %v672_v15  ;;  %v649_v25 = vld [vmem:[%s1079_s19 + $0xe0] sm:$0x7f]  ;;  %v398_v30 = vmul.f32 %v1103_v6, %v695_v9  ;;  %v426_v31 = vmul.f32 %v1108_v10, %v703_v12  ;;  %v711_v32 = vld [vmem:[%s1079_s19 + $0xd9] sm:$0x7f]  ;;  %s1198_s9 = scalar_lea.vmem [#allocation6], %s722_s20  ;;  %p1292_p11 = scmp.ne.s32.totalorder %s1287_s22, 0 }
  0x62   : > { %v293_v51 = vadd.f32 %v286_v28, %v266_v40  ;;  %v375_v16 = vadd.f32 %v368_v33, %v348_v57  ;;  %v294_v17 = vadd.f32 %v287_v49, %v267_v59  ;;  %v657_v26 = vld [vmem:[%s1079_s19 + $0xa1] sm:$0x7f]  ;;  %v344_v37 = vmul.f32 %v1099_v4, %v680_v20  ;;  %v658_v57 = vld [vmem:[%s1079_s19 + $0xa9] sm:$0x7f]  ;;  %v674_v13 = vld [vmem:[%s1079_s19 + $0x70] sm:$0x7f] }
  0x63   : > { %v665_v27 = vld [vmem:[%s1079_s19 + $0xe1] sm:$0x7f]  ;;  %v295_v36 = vadd.f32 %v288_v19, %v268_v23  ;;  %v241_v40 = vmul.f32 %v1091_v0, %v649_v25  ;;  %v262_v45 = vmul.f32 %v1093_v1, %v657_v26  ;;  %v453_v48 = vmul.f32 %v1110_v11, %v711_v32  ;;  %v666_v59 = vld [vmem:[%s1079_s19 + $0xe9] sm:$0x7f]  ;;  %v682_v19 = vld [vmem:[%s1079_s19 + $0x31] sm:$0x7f] }
  0x64   : > { %v321_v7 = vadd.f32 %v314_v41, %v293_v51  ;;  %v403_v28 = vadd.f32 %v396_v34, %v375_v16  ;;  %v322_v29 = vadd.f32 %v315_v60, %v294_v17  ;;  %v688_v33 = vld [vmem:[%s1079_s19 + $0x61] sm:$0x7f]  ;;  %v673_v41 = vld [vmem:[%s1079_s19 + $0x68] sm:$0x7f]  ;;  %v289_v46 = vmul.f32 %v1095_v2, %v665_v27  ;;  %v651_v23 = vld [vmem:[%s1079_s19 + $0xf0] sm:$0x7f] }
  0x65   : > { %v696_v34 = vld [vmem:[%s1079_s19 + $0xe0] sm:$0x7f]  ;;  %v323_v49 = vadd.f32 %v316_v24, %v295_v36  ;;  %v371_v50 = vmul.f32 %v1101_v5, %v688_v33  ;;  %v681_v51 = vld [vmem:[%s1079_s19 + $0x29] sm:$0x7f]  ;;  %v269_v55 = vadd.f32 %v262_v45, %v241_v40  ;;  %v317_v56 = vmul.f32 %v1097_v3, %v673_v41  ;;  %v659_v24 = vld [vmem:[%s1079_s19 + $0xb1] sm:$0x7f] }
  0x66   : > { %v349_v21 = vadd.f32 %v342_v52, %v321_v7  ;;  %v431_v42 = vadd.f32 %v424_v38, %v403_v28  ;;  %v350_v43 = vadd.f32 %v343_v18, %v322_v29  ;;  %v704_v44 = vld [vmem:[%s1079_s19 + $0xa1] sm:$0x7f]  ;;  %v650_v38 = vld [vmem:[%s1079_s19 + $0xe8] sm:$0x7f]  ;;  %v399_v61 = vmul.f32 %v1103_v6, %v696_v34  ;;  %v690_v29 = vld [vmem:[%s1079_s19 + $0x71] sm:$0x7f] }
  0x67   : > { %v351_v60 = vadd.f32 %v344_v37, %v323_v49  ;;  %v427_v62 = vmul.f32 %v1108_v10, %v704_v44  ;;  %v712_v7 = vld [vmem:[%s1079_s19 + $0xe1] sm:$0x7f]  ;;  %v296_v9 = vadd.f32 %v289_v46, %v269_v55  ;;  %v242_v12 = vmul.f32 %v1091_v0, %v650_v38  ;;  %v697_v16 = vld [vmem:[%s1079_s19 + $0xe8] sm:$0x7f]  ;;  %v675_v36 = vld [vmem:[%s1079_s19 + $0x78] sm:$0x7f] }
  0x68   : > { %v376_v35 = vadd.f32 %v369_v53, %v349_v21  ;;  %v458_v52 = vadd.f32 %v1138_v39, %v431_v42  ;;  %v377_v53 = vadd.f32 %v370_v22, %v350_v43  ;;  %v263_v17 = vmul.f32 %v1093_v1, %v658_v57  ;;  %v705_v26 = vld [vmem:[%s1079_s19 + $0xa9] sm:$0x7f]  ;;  %v698_v46 = vld [vmem:[%s1079_s19 + $0xf0] sm:$0x7f]  ;;  %s717_s17 = sshll.u32 (%p1292_p11), %s895_s12, 3 }
  0x69   : > { %v378_v15 = vadd.f32 %v371_v50, %v351_v60  ;;  %v290_v18 = vmul.f32 %v1095_v2, %v666_v59  ;;  %v324_v21 = vadd.f32 %v317_v56, %v296_v9  ;;  %v372_v22 = vmul.f32 %v1101_v5, %v689_v63  ;;  %v713_v40 = vld [vmem:[%s1079_s19 + $0xe9] sm:$0x7f]  ;;  %v699_v60 = vld [vmem:[%s1079_s19 + $0xf8] sm:$0x7f]  ;;  %s482_s25 = scalar_lea.vmem (%p1292_p11), %s1283_s2, %s717_s17 }
  0x6a   : > { %v404_v47 = vadd.f32 %v397_v54, %v376_v35  ;;  %465 = vst [vmem:[%s1198_s9] sm:$0x7f] %v458_v52  ;;  %v405_v39 = vadd.f32 %v398_v30, %v377_v53  ;;  %v270_v27 = vadd.f32 %v263_v17, %v242_v12  ;;  %v318_v28 = vmul.f32 %v1097_v3, %v674_v13  ;;  %v667_v30 = vld [vmem:[%s1079_s19 + $0xf1] sm:$0x7f]  ;;  %v691_v53 = vld [vmem:[%s1079_s19 + $0x79] sm:$0x7f] }
  0x6b   : > { %v406_v25 = vadd.f32 %v399_v61, %v378_v15  ;;  %v400_v33 = vmul.f32 %v1103_v6, %v697_v16  ;;  %v346_v35 = vmul.f32 %v1099_v4, %v682_v19  ;;  %v243_v42 = vmul.f32 %v1091_v0, %v651_v23  ;;  %v706_v52 = vld [vmem:[%s1079_s19 + $0xb1] sm:$0x7f] }
  0x6c   : > { %v432_v54 = vadd.f32 %v425_v58, %v404_v47  ;;  %v345_v58 = vmul.f32 %v1099_v4, %v681_v51  ;;  %v433_v20 = vadd.f32 %v426_v31, %v405_v39  ;;  %v297_v41 = vadd.f32 %v290_v18, %v270_v27 }
  0x6d   : > { %v434_v37 = vadd.f32 %v427_v62, %v406_v25  ;;  %v264_v43 = vmul.f32 %v1093_v1, %v659_v24  ;;  %v428_v44 = vmul.f32 %v1108_v10, %v705_v26  ;;  %v373_v45 = vmul.f32 %v1101_v5, %v690_v29 }
  0x6e   : > { %v459_v14 = vadd.f32 %v452_v8, %v432_v54  ;;  %v454_v8 = vmul.f32 %v1110_v11, %v712_v7  ;;  %v460_v31 = vadd.f32 %v453_v48, %v433_v20  ;;  %v352_v32 = vadd.f32 %v345_v58, %v324_v21  ;;  %v683_v48 = vld [vmem:[%s1079_s19 + $0x39] sm:$0x7f]  ;;  %v714_v54 = vld [vmem:[%s1079_s19 + $0xf1] sm:$0x7f] }
  0x6f   : > { %v291_v47 = vmul.f32 %v1095_v2, %v667_v30  ;;  %v325_v50 = vadd.f32 %v318_v28, %v297_v41  ;;  %v271_v51 = vadd.f32 %v264_v43, %v243_v42  ;;  %v319_v0 = vmul.f32 %v1097_v3, %v675_v36  ;;  %v707_v7 = vld [vmem:[%s1079_s19 + $0xb9] sm:$0x7f] }
  0x70   : > { %466 = vst [vmem:[%s1198_s9 + $0x8] sm:$0x7f] %v459_v14  ;;  %467 = vst [vmem:[%s1198_s9 + $0x10] sm:$0x7f] %v460_v31  ;;  %v379_v34 = vadd.f32 %v372_v22, %v352_v32  ;;  %v461_v49 = vadd.f32 %v454_v8, %v434_v37  ;;  %v455_v1 = vmul.f32 %v1110_v11, %v713_v40 }
  0x71   : > { %v353_v55 = vadd.f32 %v346_v35, %v325_v50  ;;  %v401_v56 = vmul.f32 %v1103_v6, %v698_v46  ;;  %v298_v2 = vadd.f32 %v291_v47, %v271_v51  ;;  %v347_v57 = vmul.f32 %v1099_v4, %v683_v48  ;;  %v715_v4 = vld [vmem:[%s1079_s19 + $0xf9] sm:$0x7f] }
  0x72   : > { %v407_v38 = vadd.f32 %v400_v33, %v379_v34  ;;  %468 = vst [vmem:[%s1198_s9 + $0x18] sm:$0x7f] %v461_v49  ;;  %v429_v3 = vmul.f32 %v1108_v10, %v706_v52  ;;  %v374_v63 = vmul.f32 %v1101_v5, %v691_v53  ;;  %v456_v58 = vmul.f32 %v1110_v11, %v714_v54 }
  0x73   : > { %v380_v61 = vadd.f32 %v373_v45, %v353_v55  ;;  %v326_v62 = vadd.f32 %v319_v0, %v298_v2  ;;  %v402_v13 = vmul.f32 %v1103_v6, %v699_v60  ;;  %v430_v16 = vmul.f32 %v1108_v10, %v707_v7  ;;  %v522_v6 = vld [vmem:[%s1198_s9] sm:$0xff] (%p1292_p11) }
  0x74   : > { %v435_v59 = vadd.f32 %v428_v44, %v407_v38  ;;  %v457_v19 = vmul.f32 %v1110_v11, %v715_v4  ;;  %523 = vst [vmem:[%s482_s25] sm:$0xff] (%p1292_p11), %v522_v6 }
  0x75   : > { %v408_v9 = vadd.f32 %v401_v56, %v380_v61  ;;  %v354_v12 = vadd.f32 %v347_v57, %v326_v62 }
  0x76   : > { %v462_v39 = vadd.f32 %v455_v1, %v435_v59 }
  0x77   : > { %v436_v14 = vadd.f32 %v429_v3, %v408_v9  ;;  %v381_v15 = vadd.f32 %v374_v63, %v354_v12  ;;  %v524_v10 = vld [vmem:[%s1198_s9 + $0x8] sm:$0xff] (%p1292_p11)  ;;  %v526_v21 = vld [vmem:[%s1198_s9 + $0x10] sm:$0xff] (%p1292_p11) }
  0x78   : > { %469 = vst [vmem:[%s1198_s9 + $0x20] sm:$0x7f] %v462_v39  ;;  %525 = vst [vmem:[%s482_s25 + $0x18] sm:$0xff] (%p1292_p11), %v524_v10 }
  0x79   : > { %v463_v17 = vadd.f32 %v456_v58, %v436_v14  ;;  %v409_v18 = vadd.f32 %v402_v13, %v381_v15  ;;  %478 = sbr.rel (!%p1292_p11) target bundleno = 136 (0x88), region = 40  ;;  %v528_v11 = vld [vmem:[%s1198_s9 + $0x18] sm:$0xff] (%p1292_p11)  ;;  %527 = vst [vmem:[%s482_s25 + $0x30] sm:$0xff] (%p1292_p11), %v526_v21 }
  0x7a   : > { %529 = vst [vmem:[%s482_s25 + $0x48] sm:$0xff] (%p1292_p11), %v528_v11 }
  0x7b   : > { %470 = vst [vmem:[%s1198_s9 + $0x28] sm:$0x7f] %v463_v17  ;;  %v437_v5 = vadd.f32 %v430_v16, %v409_v18 }
  0x7d   : > { %v464_v20 = vadd.f32 %v457_v19, %v437_v5 }
  0x7f   : > { %471 = vst [vmem:[%s1198_s9 + $0x30] sm:$0x7f] %v464_v20  ;;  %v530_v22 = vld [vmem:[%s1198_s9 + $0x20] sm:$0xff] (%p1292_p11) }
  0x80   : > { %531 = vst [vmem:[%s482_s25 + $0x60] sm:$0xff] %v530_v22 }
  0x82   : > { %v532_v23 = vld [vmem:[%s1198_s9 + $0x28] sm:$0xff] }
  0x83   : > { %533 = vst [vmem:[%s482_s25 + $0x78] sm:$0xff] %v532_v23 }
  0x86   : > { %v534_v24 = vld [vmem:[%s1198_s9 + $0x30] sm:$0xff] }
  0x87   : > { %535 = vst [vmem:[%s482_s25 + $0x90] sm:$0xff] %v534_v24 }
  0x88 PF: > { %s18_s14 = sadd.s32 1, %s903_s14   ;;  %s1293_s9 = smov %s887_s10 }
  0x89   : > { %p15_p0 = scmp.ge.s32.totalorder %s18_s14, 5   ;;  %s1294_s10 = smov %s891_s11 }
  0x8a   : > { %s1295_s11 = smov %s976_s21  ;;  %s1296_s12 = smov %s899_s13 }
  0x8b   : > { %s1297_s13 = smov %s1299_s16  ;;  %17 = sbr.rel (!%p15_p0) target bundleno = 6 (0x6), region = 125 }
  0x92   :  { %551 = vsyncpa [#allocation3], 1 }
  0x93   :  { %553 = vsyncpa [#allocation3 + $0x1], 1 }
  0x94   :  { %554 = vsyncpa [#allocation5], 1 }
  0x95   :  { %556 = vsyncpa [#allocation5 + $0x1], 1 }

</bundles_post_ra>
